<compile_context>
chip_gen: v6e
topology: v6e:2x2x1
jax: 0.10.0
libtpu: 0.0.40
codegen_flags: <defaults>
</compile_context>

<pallas_src>
import jax
import jax.numpy as jnp
from jax.experimental import pallas as pl
from jax.experimental.pallas import tpu as pltpu

_SUBLANE = 8
_NEG_BIG = -1e30     # finite "minus infinity" baked into padded b2 columns


def _round_up(x, m):
    return ((x + m - 1) // m) * m


def ffnn_kernel(x_ref, w1_ref, b1_ref, w2_ref, b2_ref, o_ref):
    # hidden = relu(x @ W1 + b1)   -- MXU matmul, f32 accumulation
    x = x_ref[...]
    h = jnp.dot(x, w1_ref[...], preferred_element_type=jnp.float32) + b1_ref[...]
    h = jnp.maximum(h, 0.0)

    # logits = h @ W2 + b2.  Padded class columns: W2 col = 0, b2 col = -1e30,
    # so they come out as -1e30 with no explicit mask needed.
    logits = jnp.dot(h, w2_ref[...], preferred_element_type=jnp.float32) + b2_ref[...]

    # Numerically stable log-softmax over the last axis; exp(-1e30 - m) == 0,
    # so padded columns contribute nothing to the sum.
    m = jnp.max(logits, axis=-1, keepdims=True)
    lse = m + jnp.log(jnp.sum(jnp.exp(logits - m), axis=-1, keepdims=True))
    o_ref[...] = (logits - lse).astype(o_ref.dtype)


def ffnn_forward(x, w1, b1, w2, b2, *, tb=2048):
    """x: (B, D); w1: (D, H); b1: (1, H); w2: (H, O); b2: (1, O) -> (B, O)."""
    B, D = x.shape
    H = w1.shape[1]
    O = w2.shape[1]

    # --- class padding: O -> next multiple of 8 (8 here), mask baked into b2 --
    o_pad = _round_up(O, _SUBLANE)
    w2_p = jnp.pad(w2, ((0, 0), (0, o_pad - O)))                            # zeros
    b2_p = jnp.pad(b2, ((0, 0), (0, o_pad - O)), constant_values=_NEG_BIG)  # -1e30

    # --- batch tiling (no wrapper-side padding of x) --------------------------
    if B <= tb:
        TB = B                      # single block equal to the full batch dim
        grid = (1,)
    else:
        TB = tb                     # multiple of 8 (f32 sublane tiling)
        grid = (pl.cdiv(B, TB),)    # last partial block: OOB reads are garbage
                                    # rows (independent), OOB writes dropped.

    # --- VMEM budget (double-buffered x/out tiles; weights counted 2x to be
    #     conservative even though their constant index_map keeps them resident)
    fbytes = 4
    vmem_needed = (
        2 * TB * D * fbytes
        + 2 * TB * o_pad * fbytes
        + 2 * (D * H + H + H * o_pad + o_pad) * fbytes
    )
    vmem_limit = int(min(max(2 * vmem_needed, 8 << 20), 48 << 20))  # < v7x 64 MiB

    # --- advisory cost estimate for XLA's scheduler ---------------------------
    cost = pl.CostEstimate(
        flops=2 * B * (D * H + H * o_pad),
        transcendentals=B * (o_pad + 1),   # exp + log
        bytes_accessed=fbytes * (B * D + D * H + H + H * o_pad + o_pad
                                 + B * o_pad),
    )

    out = pl.pallas_call(
        ffnn_kernel,
        out_shape=jax.ShapeDtypeStruct((B, o_pad), jnp.float32),
        grid=grid,
        in_specs=[
            pl.BlockSpec((TB, D), lambda i: (i, 0)),      # x tile, pipelined
            pl.BlockSpec((D, H), lambda i: (0, 0)),       # W1 resident
            pl.BlockSpec((1, H), lambda i: (0, 0)),       # b1 resident
            pl.BlockSpec((H, o_pad), lambda i: (0, 0)),   # W2 (padded) resident
            pl.BlockSpec((1, o_pad), lambda i: (0, 0)),   # b2 (padded) resident
        ],
        out_specs=pl.BlockSpec((TB, o_pad), lambda i: (i, 0)),
        compiler_params=pltpu.CompilerParams(
            dimension_semantics=("parallel",),   # both TCs on v7x once grid >= 2
            vmem_limit_bytes=vmem_limit,
        ),
        cost_estimate=cost,
    )(x, w1, b1, w2_p, b2_p)

    # Only the cheap class slice remains (a downstream NLL loss could instead
    # index into the padded (B, 8) output directly and skip even this).
    return out[:, :O]


def _jax_reference(x, w1, b1, w2, b2):
    h = jnp.maximum(x @ w1 + b1, 0.0)
    return jax.nn.log_softmax(h @ w2 + b2, axis=-1)


if __name__ == "__main__":
    # Small shapes consistent with the module: batch=2, input_dim=16, h=32, out=5
    B, D, H, O = 2, 16, 32, 5

    key = jax.random.PRNGKey(0)
    kx, kw1, kb1, kw2, kb2, kx2 = jax.random.split(key, 6)

    # Deterministic parameter init (torch Linear style: U(-1/sqrt(fan_in), ...))
    bound1 = 1.0 / jnp.sqrt(D)
    bound2 = 1.0 / jnp.sqrt(H)
    w1 = jax.random.uniform(kw1, (D, H), jnp.float32, -bound1, bound1)
    b1 = jax.random.uniform(kb1, (1, H), jnp.float32, -bound1, bound1)
    w2 = jax.random.uniform(kw2, (H, O), jnp.float32, -bound2, bound2)
    b2 = jax.random.uniform(kb2, (1, O), jnp.float32, -bound2, bound2)

    x = jax.random.normal(kx, (B, D), jnp.float32)

    out = jax.block_until_ready(ffnn_forward(x, w1, b1, w2, b2))
    ref = _jax_reference(x, w1, b1, w2, b2)
    assert out.shape == (B, O)
    assert jnp.allclose(out, ref, atol=1e-5, rtol=1e-5)

    # Secondary sanity check exercising the multi-step grid + partial last block
    # (small tb override so the test stays tiny).
    B2 = 300
    x2 = jax.random.normal(kx2, (B2, D), jnp.float32)
    out2 = jax.block_until_ready(ffnn_forward(x2, w1, b1, w2, b2, tb=128))
    ref2 = _jax_reference(x2, w1, b1, w2, b2)
    assert out2.shape == (B2, O)
    assert jnp.allclose(out2, ref2, atol=1e-5, rtol=1e-5)

    # TODO(synk): compute_Loss (NLLLoss) is a training-time loss, not part of
    # the forward pass, so it is intentionally not implemented as a kernel.

    print("KERNEL_OK")
</pallas_src>

<mosaic_0001>
module attributes {stable_mosaic.version = 11 : i64} {
  func.func @ffnn_kernel(%arg0: i32, %arg1: memref<2x16xf32, #tpu.memory_space<vmem>>, %arg2: memref<16x32xf32, #tpu.memory_space<vmem>>, %arg3: memref<1x32xf32, #tpu.memory_space<vmem>>, %arg4: memref<32x8xf32, #tpu.memory_space<vmem>>, %arg5: memref<1x8xf32, #tpu.memory_space<vmem>>, %arg6: memref<2x8xf32, #tpu.memory_space<vmem>>) attributes {dimension_semantics = [#tpu.dimension_semantics<parallel>], iteration_bounds = array<i64: 1>, scalar_prefetch = 0 : i64, scratch_operands = 0 : i64, tpu.core_type = #tpu.core_type<tc>, window_params = [{transform_indices = @transform_0, window_bounds = array<i64: 2, 16>}, {pipeline_mode = #tpu.pipeline_mode<synchronous>, transform_indices = @transform_1, window_bounds = array<i64: 16, 32>}, {pipeline_mode = #tpu.pipeline_mode<synchronous>, transform_indices = @transform_2, window_bounds = array<i64: 1, 32>}, {pipeline_mode = #tpu.pipeline_mode<synchronous>, transform_indices = @transform_3, window_bounds = array<i64: 32, 8>}, {pipeline_mode = #tpu.pipeline_mode<synchronous>, transform_indices = @transform_4, window_bounds = array<i64: 1, 8>}, {transform_indices = @transform_5, window_bounds = array<i64: 2, 8>}]} {
    %c0 = arith.constant 0 : index
    %c0_0 = arith.constant 0 : index
    %0 = vector.load %arg1[%c0, %c0_0] : memref<2x16xf32, #tpu.memory_space<vmem>>, vector<2x16xf32>
    %c0_1 = arith.constant 0 : index
    %c0_2 = arith.constant 0 : index
    %1 = vector.load %arg2[%c0_1, %c0_2] : memref<16x32xf32, #tpu.memory_space<vmem>>, vector<16x32xf32>
    %cst = arith.constant dense<0.000000e+00> : vector<2x32xf32>
    %2 = tpu.matmul %0, %1, %cst {dimension_numbers = #tpu.dot_dimension_numbers<[1], [0], [0], [1], [0, 0, 1, 1], [], []>} : vector<2x16xf32>, vector<16x32xf32>, vector<2x32xf32> -> vector<2x32xf32>
    %c0_3 = arith.constant 0 : index
    %c0_4 = arith.constant 0 : index
    %3 = vector.load %arg3[%c0_3, %c0_4] : memref<1x32xf32, #tpu.memory_space<vmem>>, vector<1x32xf32>
    %4 = vector.broadcast %3 : vector<1x32xf32> to vector<2x32xf32>
    %5 = arith.addf %2, %4 : vector<2x32xf32>
    %cst_5 = arith.constant 0.000000e+00 : f32
    %6 = vector.broadcast %cst_5 : f32 to vector<2x32xf32>
    %7 = arith.maximumf %5, %6 : vector<2x32xf32>
    %c0_6 = arith.constant 0 : index
    %c0_7 = arith.constant 0 : index
    %8 = vector.load %arg4[%c0_6, %c0_7] : memref<32x8xf32, #tpu.memory_space<vmem>>, vector<32x8xf32>
    %cst_8 = arith.constant dense<0.000000e+00> : vector<2x8xf32>
    %9 = tpu.matmul %7, %8, %cst_8 {dimension_numbers = #tpu.dot_dimension_numbers<[1], [0], [0], [1], [0, 0, 1, 1], [], []>} : vector<2x32xf32>, vector<32x8xf32>, vector<2x8xf32> -> vector<2x8xf32>
    %c0_9 = arith.constant 0 : index
    %c0_10 = arith.constant 0 : index
    %10 = vector.load %arg5[%c0_9, %c0_10] : memref<1x8xf32, #tpu.memory_space<vmem>>, vector<1x8xf32>
    %11 = vector.broadcast %10 : vector<1x8xf32> to vector<2x8xf32>
    %12 = arith.addf %9, %11 : vector<2x8xf32>
    %cst_11 = arith.constant dense<0xFF800000> : vector<2xf32>
    %13 = vector.multi_reduction <maximumf>, %12, %cst_11 [1] : vector<2x8xf32> to vector<2xf32>
    %14 = vector.shape_cast %13 : vector<2xf32> to vector<2x1xf32>
    %15 = vector.broadcast %14 : vector<2x1xf32> to vector<2x8xf32>
    %16 = arith.subf %12, %15 : vector<2x8xf32>
    %17 = math.exp %16 : vector<2x8xf32>
    %cst_12 = arith.constant dense<0.000000e+00> : vector<2xf32>
    %18 = vector.multi_reduction <add>, %17, %cst_12 [1] : vector<2x8xf32> to vector<2xf32>
    %19 = vector.shape_cast %18 : vector<2xf32> to vector<2x1xf32>
    %20 = math.log %19 : vector<2x1xf32>
    %21 = arith.addf %14, %20 : vector<2x1xf32>
    %22 = vector.broadcast %21 : vector<2x1xf32> to vector<2x8xf32>
    %23 = arith.subf %12, %22 : vector<2x8xf32>
    %c0_13 = arith.constant 0 : index
    %c0_14 = arith.constant 0 : index
    %24 = vector.load %arg6[%c0_13, %c0_14] : memref<2x8xf32, #tpu.memory_space<vmem>>, vector<2x8xf32>
    tpu.vector_store %arg6[%c0_13, %c0_14], %23 {strides = array<i32>} : memref<2x8xf32, #tpu.memory_space<vmem>>, vector<2x8xf32>,
    return
  }
  func.func @transform_0(%arg0: i32) -> (i32, i32) {
    %c0_i32 = arith.constant 0 : i32
    %c0_i32_0 = arith.constant 0 : i32
    return %arg0, %c0_i32 : i32, i32
  }
  func.func @transform_1(%arg0: i32) -> (i32, i32) {
    %c0_i32 = arith.constant 0 : i32
    %c0_i32_0 = arith.constant 0 : i32
    %c0_i32_1 = arith.constant 0 : i32
    return %c0_i32, %c0_i32_0 : i32, i32
  }
  func.func @transform_2(%arg0: i32) -> (i32, i32) {
    %c0_i32 = arith.constant 0 : i32
    %c0_i32_0 = arith.constant 0 : i32
    %c0_i32_1 = arith.constant 0 : i32
    return %c0_i32, %c0_i32_0 : i32, i32
  }
  func.func @transform_3(%arg0: i32) -> (i32, i32) {
    %c0_i32 = arith.constant 0 : i32
    %c0_i32_0 = arith.constant 0 : i32
    %c0_i32_1 = arith.constant 0 : i32
    return %c0_i32, %c0_i32_0 : i32, i32
  }
  func.func @transform_4(%arg0: i32) -> (i32, i32) {
    %c0_i32 = arith.constant 0 : i32
    %c0_i32_0 = arith.constant 0 : i32
    %c0_i32_1 = arith.constant 0 : i32
    return %c0_i32, %c0_i32_0 : i32, i32
  }
  func.func @transform_5(%arg0: i32) -> (i32, i32) {
    %c0_i32 = arith.constant 0 : i32
    %c0_i32_0 = arith.constant 0 : i32
    return %arg0, %c0_i32 : i32, i32
  }
}

</mosaic_0001>

<bundles_post_ra>
// kernel: tpu_custom_call.1
= control target key start
LH: loop header
LB: loop body
LE: loop exit
PB: predicated region body
PF: predicated region fallthrough
CT: control target
= control target key end

     0   :  { %v279_v1 = vmov 0.0   ;;  %vm280_vm0 = vmmov 0   ;;  %s345_s0 = inlined_call_operand.vmem [shape: f32[2,16], index: 0, kind: input, shape index: {}]   ;;  %s346_s1 = inlined_call_operand.vmem [shape: f32[16,32], index: 1, kind: input, shape index: {}]   ;;  %s347_s2 = inlined_call_operand.vmem [shape: f32[1,32], index: 2, kind: input, shape index: {}]   ;;  %s348_s3 = inlined_call_operand.vmem [shape: f32[32,8], index: 3, kind: input, shape index: {}]   ;;  %s349_s4 = inlined_call_operand.vmem [shape: f32[1,8], index: 4, kind: input, shape index: {}]   ;;  %s350_s5 = inlined_call_operand.hbm [shape: f32[2,8], index: 5, kind: output, shape index: {}]  }
   0x1   :  { %v23_v0 = vld [vmem:[%s346_s1 + $0x8] sm:$0xff]  ;;  %232 = vmatprep.subr.mxu0 %v279_v1  ;;  %v22_v2 = vld [vmem:[%s346_s1] sm:$0xff]  ;;  %236 = vmatprep.mubr.msk.f32.mxu0 %vm280_vm0, %v279_v1  ;;  %v109_v3 = vld [vmem:[%s348_s3 + $0x18] sm:$0xff] }
   0x2   :  { %10 = vsyncpa [#allocation3], 0  ;;  %233 = vmatpush3.msra.mxu0 %v23_v0  ;;  %v21_v4 = vld [vmem:[%s345_s0] sm:$0x3]  ;;  %vm31_vm1 = vcmask 130048   ;;  %239 = vmatprep.subr.mxu1 %v279_v1  ;;  %v108_v5 = vld [vmem:[%s348_s3 + $0x10] sm:$0xff] }
   0x3   :  { %234 = vmatprep.subr.mxu0 %v279_v1  ;;  %240 = vmatpush3.msra.mxu1 %v109_v3  ;;  %v107_v6 = vld [vmem:[%s348_s3 + $0x8] sm:$0xff]  ;;  %v106_v7 = vld [vmem:[%s348_s3] sm:$0xff]  ;;  %vm117_vm2 = vcmask 261120   ;;  %vm191_vm3 = vcmask 58368  }
   0x4   :  { %235 = vmatpush3.msra.mxu0 %v22_v2  ;;  %241 = vmatprep.subr.mxu1 %v279_v1  ;;  %v220_v8 = vld [vmem:[%s347_s2] ss:$0 sm:$0xff]  ;;  %s281_s2 = smov [#allocation2]  }
   0x5   :  { %237 = vmatmul.mubr.msk.f32.vlgmr.msra.gmra.mxu0 %vm31_vm1, %v21_v4  ;;  %247 = vmatprep.mubr.msk.f32.mxu1 %vm280_vm0, %v279_v1  ;;  %v222_v13 = vld [vmem:[%s349_s4] ss:$0 sm:$0xff]  ;;  %s212_s3 = sshll.u32 %s281_s2, 4  ;;  %s213_s3 = int_to_ptr.vmem [resolvable:$true] %s212_s3 }
   0x6   :  { %242 = vmatpush3.msra.mxu1 %v108_v5  ;;  %s257_s4 = scalar_lea.vmem %s213_s3, 32  ;;  %p262_p1 = scmp.lt.s32.totalorder %s213_s3, %s213_s3 }
   0x7   :  { %243 = vmatprep.subr.mxu1 %v279_v1  ;;  %p258_p0 = scmp.ne.s32.totalorder %s213_s3, %s257_s4  ;;  %p263_p2 = scmp.lt.s32.totalorder %s257_s4, %s257_s4 }
   0x8   :  { %244 = vmatpush3.msra.mxu1 %v107_v6 }
   0x9   :  { %245 = vmatprep.subr.mxu1 %v279_v1  ;;  %p264_p3 = por %p263_p2, %p262_p1 }
   0xa   :  { %246 = vmatpush3.msra.mxu1 %v106_v7 }
   0xb   :  { %p265_p4 = pnand %p264_p3, %p258_p0 }
  0xc5   :  { %v101_v9 = vpop.f32.mrf.mxu0 }
  0xc6   :  { %v102_v10 = vadd.f32 %v220_v8, %v101_v9 }
  0xc7   :  { %v238_v11 = vpop.f32.mrf.mxu0 }
  0xc8   :  { %v105_v12 = vmax.f32 %v102_v10, 0.0 }
  0xca   :  { %248 = vmatmul.mubr.msk.f32.vlgmr.msra.gmra.mxu1 %vm117_vm2, %v105_v12 }
 0x18a   :  { %v187_v14 = vpop.f32.mrf.mxu1 }
 0x18b   :  { %v188_v15 = vadd.f32 %v222_v13, %v187_v14 }
 0x18c   :  { %v249_v16 = vpop.f32.mrf.mxu1 }
 0x18d   :  { %v192_v17 = vsel %vm191_vm3, %v188_v15, -inf }
 0x18e   :  { %193 = vmax.xlane.f32.xlu0 %v192_v17 }
 0x217   :  { %v194_v18 = vpop.xlane.xlu0 %193 }
 0x218   :  { %v195_v19 = vsub.f32 %v188_v15, %v194_v18 }
 0x21a   :  { %v196_v20 = vmul.f32 1.442695, %v195_v19 }
 0x21c   :  { %253 = vpow2.f32 %v196_v20 }
 0x229   :  { %v254_v21 = vpop.eup %253 }
 0x22a   :  { %v198_v22 = vsel %vm191_vm3, %v254_v21, 0.0 }
 0x22b   :  { %199 = vadd.xlane.f32.xlu0 %v198_v22 }
 0x2b4   :  { %v200_v23 = vpop.xlane.xlu0 %199 }
 0x2b5   :  { %255 = vlog2.f32 %v200_v23 }
 0x2c2   :  { %v256_v24 = vpop.eup %255 }
 0x2c3   :  { %v202_v25 = vmul.f32 0.6931472, %v256_v24 }
 0x2c5   :  { %v203_v26 = vadd.f32 %v202_v25, %v194_v18 }
 0x2c7   :  { %v204_v27 = vsub.f32 %v188_v15, %v203_v26 }
 0x2c9   :  { %205 = vst.msk [vmem:[#allocation2] sm:$0x3] %vm191_vm3, %v204_v27 }
 0x2ca   :  { %268 = shalt.err (!%p265_p4)
}
 0x2cb   :  { %215 = dma.vmem_to_hbm [thread:$0]  %s213_s3, 32, %s350_s5, [#allocation3]  }
 0x2cc   :  { %277 = dma.done.wait [#allocation3], 32  }
 0x2cd   :  { %278 = vsyncadd [#allocation3], 4294967264 }
 0x2ce   :  { %219 = vsyncpa [#allocation3], 1 }

</bundles_post_ra>
